<compile_context>
chip_gen: v6e
topology: v6e:2x2x1
jax: 0.10.0
libtpu: 0.0.40
codegen_flags: <defaults>
</compile_context>

<pallas_src>
import functools

import jax
import jax.numpy as jnp
import numpy as np
from jax import lax
from jax.experimental import pallas as pl
from jax.experimental.pallas import tpu as pltpu


def _multihead_kernel(z_i_ref, z_j_ref, ua_ref, wa_ref, bs_ref, v_ref, o_ref,
                      *, activation):
    """One (batch, i-tile, j-tile) block of the bi-affine relation scorer.

    z_i_ref : (Ti, D)     rows of z for this i-tile (batch dim squeezed)
    z_j_ref : (Tj, D)     rows of z for this j-tile
    ua_ref  : (D, H)      resident weight
    wa_ref  : (D, H)      resident weight
    bs_ref  : (1, H)      resident bias
    v_ref   : (H, R)      resident weight
    o_ref   : (Ti, Tj*R)  lane-dense output block (index = j*R + p, matching torch .view)
    """
    z_i = z_i_ref[...]
    z_j = z_j_ref[...]

    # MXU: per-tile projections.
    left = jnp.dot(z_i, ua_ref[...], preferred_element_type=jnp.float32)    # (Ti, H)
    right = jnp.dot(z_j, wa_ref[...], preferred_element_type=jnp.float32)   # (Tj, H)
    right = right + bs_ref[...]                                             # fold bias once

    # outer[i, j, h] = left[i, h] + right[j, h] + b[h]  (matches torch broadcasting()).
    # NOTE: for production shapes with H < 128 a (Ti, H, Tj) layout (S on lanes) would
    # improve VPU/EUP lane utilization ~4x; kept H-minor here for a proven-clean lowering.
    outer = left[:, None, :] + right[None, :, :]                            # (Ti, Tj, H)
    if activation == "tanh":
        act = jnp.tanh(outer)
    else:  # 'relu'
        act = jnp.maximum(outer, 0.0)

    # g[i, j, p] = sum_h act[i, j, h] * v[h, p]
    g = lax.dot_general(
        act, v_ref[...],
        dimension_numbers=(((2,), (0,)), ((), ())),
        preferred_element_type=jnp.float32,
    )                                                                        # (Ti, Tj, R)

    ti, tj, r = g.shape
    # round(sigmoid(g)) == 1  iff  g > 0  (sigmoid(0)=0.5 rounds half-to-even -> 0).
    # Compare+select runs on the VPU; the flatten makes the store lane-dense (Tj*R lanes).
    o_ref[...] = (g.reshape(ti, tj * r) > 0.0).astype(o_ref.dtype)


def _choose_tiles(S, D, H, R, budget_bytes=20 * 1024 * 1024):
    """Pick (Ti, Tj) so per-step VMEM fits a v7x-safe budget (~1/3 of 64 MiB)."""
    def bytes_needed(ti, tj):
        act = ti * tj * H * 4                  # tanh intermediate
        g = ti * tj * R * 4                    # MXU result
        out = 2 * ti * tj * R * 4              # double-buffered output block
        zin = 2 * 2 * (ti + tj) * D * 4        # double-buffered z tiles
        return act + g + out + zin

    def ok_ti(t):
        return S % t == 0 and (t % 8 == 0 or t == S)

    def ok_tj(t):
        # Tj is a sublane dim for z_j and (Tj*R) is the lane dim of the output block.
        return S % t == 0 and (t % 8 == 0 or t == S) and ((t * R) % 128 == 0 or t == S)

    if bytes_needed(S, S) <= budget_bytes:
        return S, S                            # small S: one tile per batch element

    ti_c = [t for t in range(S, 0, -1) if ok_ti(t)]
    tj_c = [t for t in range(S, 0, -1) if ok_tj(t)]
    pairs = sorted(((ti, tj) for ti in ti_c for tj in tj_c),
                   key=lambda p: p[0] * p[1], reverse=True)
    for ti, tj in pairs:
        if bytes_needed(ti, tj) <= budget_bytes:
            return ti, tj
    return ti_c[-1], tj_c[-1]                  # fallback; vmem_limit gives extra slack


def multihead_forward(lstm_output, pred_ner, params, activation="tanh"):
    """Pallas-backed equivalent of MultiHeadLayers.forward (eval mode)."""
    u_a = params["u_a"].astype(jnp.float32)
    w_a = params["w_a"].astype(jnp.float32)
    v = params["v"].astype(jnp.float32)
    b_s = params["b_s"].astype(jnp.float32)
    label_emb = params.get("label_emb", None)

    # Glue: dropout_1/dropout_2 are identity in eval mode; embedding + concat in plain JAX.
    if label_emb is not None and label_emb.shape[1] != 0:
        embedded = jnp.take(label_emb.astype(jnp.float32), pred_ner, axis=0)
        z = jnp.concatenate([lstm_output.astype(jnp.float32), embedded], axis=2)
    else:
        z = lstm_output.astype(jnp.float32)

    B, S, D = z.shape
    H = u_a.shape[1]
    R = v.shape[1]

    Ti, Tj = _choose_tiles(S, D, H, R)
    grid = (B, S // Ti, S // Tj)

    kernel = functools.partial(_multihead_kernel, activation=activation)

    out = pl.pallas_call(
        kernel,
        out_shape=jax.ShapeDtypeStruct((B, S, S * R), jnp.float32),
        grid=grid,
        in_specs=[
            pl.BlockSpec((None, Ti, D), lambda b, i, j: (b, i, 0)),   # z rows, i-tile
            pl.BlockSpec((None, Tj, D), lambda b, i, j: (b, j, 0)),   # z rows, j-tile
            pl.BlockSpec((D, H), lambda b, i, j: (0, 0)),             # u_a (resident)
            pl.BlockSpec((D, H), lambda b, i, j: (0, 0)),             # w_a (resident)
            pl.BlockSpec((1, H), lambda b, i, j: (0, 0)),             # b_s (resident)
            pl.BlockSpec((H, R), lambda b, i, j: (0, 0)),             # v   (resident)
        ],
        out_specs=pl.BlockSpec((None, Ti, Tj * R), lambda b, i, j: (b, i, j)),
        compiler_params=pltpu.CompilerParams(
            # Every grid step writes a distinct output block -> no reduction axis.
            dimension_semantics=("parallel", "parallel", "parallel"),
            # Explicit, v7x-safe scoped-VMEM limit (64 MiB physical on v7x).
            vmem_limit_bytes=48 * 1024 * 1024,
        ),
    )(z, z, u_a, w_a, b_s.reshape(1, H), v)

    return out  # already (B, S, S*R), lane-dense straight out of the kernel


def multihead_reference(lstm_output, pred_ner, params, activation="tanh"):
    """Pure-JAX reference mirroring the PyTorch forward (eval mode)."""
    u_a, w_a, v, b_s, label_emb = (
        params["u_a"], params["w_a"], params["v"], params["b_s"], params["label_emb"],
    )
    embedded = jnp.take(label_emb, pred_ner, axis=0)
    z = jnp.concatenate([lstm_output, embedded], axis=2)
    left = jnp.einsum("aij,jk->aik", z, u_a)
    right = jnp.einsum("aij,jk->aik", z, w_a)
    outer = left[:, :, None, :] + right[:, None, :, :] + b_s
    act = jnp.tanh(outer) if activation == "tanh" else jnp.maximum(outer, 0.0)
    g = jnp.einsum("aijk,kp->aijp", act, v)
    B, S = g.shape[0], g.shape[1]
    g = g.reshape(B, S, -1)
    return jnp.round(jax.nn.sigmoid(g))


if __name__ == "__main__":
    # Small shapes consistent with the module.
    BATCH = 2
    SEQ = 8
    LSTM_HIDDEN = 32
    LABEL_EMB = 16
    HIDDEN = 32
    NER_SIZE = 5
    REL_SIZE = 4
    D = LSTM_HIDDEN + LABEL_EMB

    key = jax.random.PRNGKey(0)
    k_lstm, k_ner, k_ua, k_wa, k_v, k_b, k_emb = jax.random.split(key, 7)

    # Deterministic parameter init (shapes match __init__). Scale 0.1 keeps tanh out of
    # hard saturation so the 0/1 predictions are a meaningful test.
    params = {
        "u_a": 0.1 * jax.random.normal(k_ua, (D, HIDDEN), jnp.float32),
        "w_a": 0.1 * jax.random.normal(k_wa, (D, HIDDEN), jnp.float32),
        "v": 0.1 * jax.random.normal(k_v, (HIDDEN, REL_SIZE), jnp.float32),
        "b_s": 0.1 * jax.random.normal(k_b, (HIDDEN,), jnp.float32),
        "label_emb": 0.1 * jax.random.normal(k_emb, (NER_SIZE, LABEL_EMB), jnp.float32),
    }

    lstm_output = jax.random.normal(k_lstm, (BATCH, SEQ, LSTM_HIDDEN), jnp.float32)
    pred_ner = jax.random.randint(k_ner, (BATCH, SEQ), 0, NER_SIZE, jnp.int32)

    out = multihead_forward(lstm_output, pred_ner, params)
    out = jax.block_until_ready(out)

    ref = jax.block_until_ready(multihead_reference(lstm_output, pred_ner, params))
    np.testing.assert_allclose(np.asarray(out), np.asarray(ref), atol=1e-5)
    assert out.shape == (BATCH, SEQ, SEQ * REL_SIZE)

    # TODO(synk): dropout layers implemented as identity (eval mode); training-time
    # stochastic dropout would need pltpu.prng_* inside the kernel.
    print("KERNEL_OK")
</pallas_src>

<mosaic_0001>
module attributes {stable_mosaic.version = 11 : i64} {
  func.func @_multihead_kernel(%arg0: i32, %arg1: i32, %arg2: i32, %arg3: memref<1x8x48xf32, #tpu.memory_space<vmem>>, %arg4: memref<1x8x48xf32, #tpu.memory_space<vmem>>, %arg5: memref<48x32xf32, #tpu.memory_space<vmem>>, %arg6: memref<48x32xf32, #tpu.memory_space<vmem>>, %arg7: memref<1x32xf32, #tpu.memory_space<vmem>>, %arg8: memref<32x4xf32, #tpu.memory_space<vmem>>, %arg9: memref<1x8x32xf32, #tpu.memory_space<vmem>>) attributes {dimension_semantics = [#tpu.dimension_semantics<parallel>, #tpu.dimension_semantics<parallel>, #tpu.dimension_semantics<parallel>], iteration_bounds = array<i64: 2, 1, 1>, scalar_prefetch = 0 : i64, scratch_operands = 0 : i64, tpu.core_type = #tpu.core_type<tc>, window_params = [{transform_indices = @transform_0, window_bounds = array<i64: 1, 8, 48>}, {transform_indices = @transform_1, window_bounds = array<i64: 1, 8, 48>}, {pipeline_mode = #tpu.pipeline_mode<synchronous>, transform_indices = @transform_2, window_bounds = array<i64: 48, 32>}, {pipeline_mode = #tpu.pipeline_mode<synchronous>, transform_indices = @transform_3, window_bounds = array<i64: 48, 32>}, {pipeline_mode = #tpu.pipeline_mode<synchronous>, transform_indices = @transform_4, window_bounds = array<i64: 1, 32>}, {pipeline_mode = #tpu.pipeline_mode<synchronous>, transform_indices = @transform_5, window_bounds = array<i64: 32, 4>}, {transform_indices = @transform_6, window_bounds = array<i64: 1, 8, 32>}]} {
    %c0 = arith.constant 0 : index
    %c0_0 = arith.constant 0 : index
    %c0_1 = arith.constant 0 : index
    %0 = vector.load %arg3[%c0, %c0_0, %c0_1] : memref<1x8x48xf32, #tpu.memory_space<vmem>>, vector<1x8x48xf32>
    %1 = vector.shape_cast %0 : vector<1x8x48xf32> to vector<8x48xf32>
    %c0_2 = arith.constant 0 : index
    %c0_3 = arith.constant 0 : index
    %c0_4 = arith.constant 0 : index
    %2 = vector.load %arg4[%c0_2, %c0_3, %c0_4] : memref<1x8x48xf32, #tpu.memory_space<vmem>>, vector<1x8x48xf32>
    %3 = vector.shape_cast %2 : vector<1x8x48xf32> to vector<8x48xf32>
    %c0_5 = arith.constant 0 : index
    %c0_6 = arith.constant 0 : index
    %4 = vector.load %arg5[%c0_5, %c0_6] : memref<48x32xf32, #tpu.memory_space<vmem>>, vector<48x32xf32>
    %cst = arith.constant dense<0.000000e+00> : vector<8x32xf32>
    %5 = tpu.matmul %1, %4, %cst {dimension_numbers = #tpu.dot_dimension_numbers<[1], [0], [0], [1], [0, 0, 1, 1], [], []>} : vector<8x48xf32>, vector<48x32xf32>, vector<8x32xf32> -> vector<8x32xf32>
    %c0_7 = arith.constant 0 : index
    %c0_8 = arith.constant 0 : index
    %6 = vector.load %arg6[%c0_7, %c0_8] : memref<48x32xf32, #tpu.memory_space<vmem>>, vector<48x32xf32>
    %cst_9 = arith.constant dense<0.000000e+00> : vector<8x32xf32>
    %7 = tpu.matmul %3, %6, %cst_9 {dimension_numbers = #tpu.dot_dimension_numbers<[1], [0], [0], [1], [0, 0, 1, 1], [], []>} : vector<8x48xf32>, vector<48x32xf32>, vector<8x32xf32> -> vector<8x32xf32>
    %c0_10 = arith.constant 0 : index
    %c0_11 = arith.constant 0 : index
    %8 = vector.load %arg7[%c0_10, %c0_11] : memref<1x32xf32, #tpu.memory_space<vmem>>, vector<1x32xf32>
    %9 = vector.broadcast %8 : vector<1x32xf32> to vector<8x32xf32>
    %10 = arith.addf %7, %9 : vector<8x32xf32>
    %11 = vector.shape_cast %5 : vector<8x32xf32> to vector<8x1x32xf32>
    %12 = vector.shape_cast %10 : vector<8x32xf32> to vector<1x8x32xf32>
    %13 = vector.broadcast %11 : vector<8x1x32xf32> to vector<8x8x32xf32>
    %14 = vector.broadcast %12 : vector<1x8x32xf32> to vector<8x8x32xf32>
    %15 = arith.addf %13, %14 : vector<8x8x32xf32>
    %16 = math.tanh %15 : vector<8x8x32xf32>
    %c0_12 = arith.constant 0 : index
    %c0_13 = arith.constant 0 : index
    %17 = vector.load %arg8[%c0_12, %c0_13] : memref<32x4xf32, #tpu.memory_space<vmem>>, vector<32x4xf32>
    %cst_14 = arith.constant dense<0.000000e+00> : vector<8x8x4xf32>
    %18 = tpu.matmul %16, %17, %cst_14 {dimension_numbers = #tpu.dot_dimension_numbers<[2], [0], [0, 1], [1], [0, 0, 0, 1, 1, 1], [], []>} : vector<8x8x32xf32>, vector<32x4xf32>, vector<8x8x4xf32> -> vector<8x8x4xf32>
    %19 = vector.shape_cast %18 : vector<8x8x4xf32> to vector<8x32xf32>
    %cst_15 = arith.constant 0.000000e+00 : f32
    %20 = vector.broadcast %cst_15 : f32 to vector<8x32xf32>
    %21 = arith.cmpf ogt, %19, %20 : vector<8x32xf32>
    %22 = arith.extui %21 : vector<8x32xi1> to vector<8x32xi32>
    %23 = arith.sitofp %22 : vector<8x32xi32> to vector<8x32xf32>
    %c0_16 = arith.constant 0 : index
    %c0_17 = arith.constant 0 : index
    %c0_18 = arith.constant 0 : index
    %24 = vector.load %arg9[%c0_16, %c0_17, %c0_18] : memref<1x8x32xf32, #tpu.memory_space<vmem>>, vector<1x8x32xf32>
    %25 = vector.shape_cast %24 : vector<1x8x32xf32> to vector<8x32xf32>
    %26 = vector.shape_cast %23 : vector<8x32xf32> to vector<1x8x32xf32>
    tpu.vector_store %arg9[%c0_16, %c0_17, %c0_18], %26 {strides = array<i32>} : memref<1x8x32xf32, #tpu.memory_space<vmem>>, vector<1x8x32xf32>,
    return
  }
  func.func @transform_0(%arg0: i32, %arg1: i32, %arg2: i32) -> (i32, i32, i32) {
    %c0_i32 = arith.constant 0 : i32
    %c0_i32_0 = arith.constant 0 : i32
    return %arg0, %arg1, %c0_i32 : i32, i32, i32
  }
  func.func @transform_1(%arg0: i32, %arg1: i32, %arg2: i32) -> (i32, i32, i32) {
    %c0_i32 = arith.constant 0 : i32
    %c0_i32_0 = arith.constant 0 : i32
    return %arg0, %arg2, %c0_i32 : i32, i32, i32
  }
  func.func @transform_2(%arg0: i32, %arg1: i32, %arg2: i32) -> (i32, i32) {
    %c0_i32 = arith.constant 0 : i32
    %c0_i32_0 = arith.constant 0 : i32
    %c0_i32_1 = arith.constant 0 : i32
    return %c0_i32, %c0_i32_0 : i32, i32
  }
  func.func @transform_3(%arg0: i32, %arg1: i32, %arg2: i32) -> (i32, i32) {
    %c0_i32 = arith.constant 0 : i32
    %c0_i32_0 = arith.constant 0 : i32
    %c0_i32_1 = arith.constant 0 : i32
    return %c0_i32, %c0_i32_0 : i32, i32
  }
  func.func @transform_4(%arg0: i32, %arg1: i32, %arg2: i32) -> (i32, i32) {
    %c0_i32 = arith.constant 0 : i32
    %c0_i32_0 = arith.constant 0 : i32
    %c0_i32_1 = arith.constant 0 : i32
    return %c0_i32, %c0_i32_0 : i32, i32
  }
  func.func @transform_5(%arg0: i32, %arg1: i32, %arg2: i32) -> (i32, i32) {
    %c0_i32 = arith.constant 0 : i32
    %c0_i32_0 = arith.constant 0 : i32
    %c0_i32_1 = arith.constant 0 : i32
    return %c0_i32, %c0_i32_0 : i32, i32
  }
  func.func @transform_6(%arg0: i32, %arg1: i32, %arg2: i32) -> (i32, i32, i32) {
    %c0_i32 = arith.constant 0 : i32
    return %arg0, %arg1, %arg2 : i32, i32, i32
  }
}

</mosaic_0001>

<bundles_post_ra>
// kernel: tpu_custom_call.1
= control target key start
LH: loop header
LB: loop body
LE: loop exit
PB: predicated region body
PF: predicated region fallthrough
CT: control target
= control target key end

     0   :  { %11 = vsyncpa [#allocation3], 0  ;;  %s1510_s0 = inlined_call_operand.vmem [shape: f32[2,8,48], index: 0, kind: input, shape index: {}]   ;;  %s1511_s1 = inlined_call_operand.vmem [shape: f32[2,8,48], index: 1, kind: input, shape index: {}]   ;;  %s1512_s2 = inlined_call_operand.vmem [shape: f32[48,32], index: 2, kind: input, shape index: {}]   ;;  %s1513_s3 = inlined_call_operand.vmem [shape: f32[48,32], index: 3, kind: input, shape index: {}]   ;;  %s1514_s4 = inlined_call_operand.vmem [shape: f32[1,32], index: 4, kind: input, shape index: {}]   ;;  %s1515_s5 = inlined_call_operand.vmem [shape: f32[32,4], index: 5, kind: input, shape index: {}]   ;;  %s1516_s6 = inlined_call_operand.hbm [shape: f32[2,8,32], index: 6, kind: output, shape index: {}]  }
   0x1   :  { %13 = vsyncpa [#allocation3 + $0x1], 0  ;;  %s1314_s21 = smov 0   ;;  %s1316_s22 = smov 0  }
   0x2   :  { %s1318_s23 = smov 0   ;;  %s1320_s24 = smov 0  }
   0x3   :  { %s1322_s25 = smov 0   ;;  %s1324_s26 = smov 0  }
   0x4 LB: > { %s1005_s27 = sadd.s32 4294967295, %s1264_s26   ;;  %s1006_s28 = sadd.s32 4294967294, %s1264_s26   ;;  %s1264_s26 = sphi %s1324_s26, %s19_s26   ;;  %s1260_s25 = sphi %s1322_s25, %s1523_s25   ;;  %s1256_s24 = sphi %s1320_s24, %s1522_s24   ;;  %s1252_s23 = sphi %s1318_s23, %s1521_s23   ;;  %s1248_s22 = sphi %s1316_s22, %s1520_s22   ;;  %s1244_s21 = sphi %s1314_s21, %s1519_s21  }
   0x5   : > { %s38_s29 = sadd.s32 1, %s1260_s25  ;;  %s189_s30 = sadd.s32 1, %s1252_s23 }
   0x6   : > { %p40_p0 = scmp.ge.s32.totalorder %s38_s29, 2  ;;  %p199_p1 = scmp.ne.s32.totalorder %s1252_s23, %s1248_s22 }
   0x7   : > { %p200_p2 = scmp.eq.s32.totalorder %s1005_s27, 1  ;;  %p205_p3 = scmp.ne.s32.totalorder %s1248_s22, %s1244_s21 }
   0x8   : > { %s1525_s29 = smov (%p40_p0, %s38_s29), 0  ;;  %p206_p5 = scmp.eq.s32.totalorder %s1006_s28, 1 }
   0x9   : > { %p1354_p4 = por %p200_p2, %p199_p1  ;;  %s182_s8 = ssub.s32 %s1260_s25, %s1525_s29 }
   0xa   : > { %p1009_p6 = scmp.ge.s32.totalorder %s1264_s26, 1  ;;  %p187_p7 = scmp.eq.s32.totalorder %s182_s8, 0 }
   0xb   : > { %p1361_p8 = por %p206_p5, %p205_p3  ;;  %p256_p9 = scmp.lt.s32.totalorder %s1264_s26, 3 }
   0xc   : > { %s1367_s10 = scalar_select %p187_p7, %s1252_s23, %s189_s30  }
   0xd   : > { %p257_p10 = pnand %p1009_p6, %p256_p9 }
   0xe   : > { %p295_p11 = scmp.lt.s32.totalorder (!%p257_p10), %s1256_s24, 1  ;;  %s1271_s12 = smov (!%p257_p10), 12  }
   0xf   : > { %260 = sbr.rel (%p257_p10) target bundleno = 618 (0x26a), region = 44  ;;  %s1272_s13 = smov (!%p257_p10), 4  }
  0x10   : > { %s1273_s14 = smov (!%p257_p10), 16   ;;  %s1276_s16 = smov (!%p257_p10), 20  }
  0x11   : > { %s1277_s17 = smov (!%p257_p10), 28   ;;  %s292_s19 = sand.u32 (!%p257_p10), 1, %s1248_s22  }
  0x12   : > { %s1010_s20 = sshll.u32 (!%p257_p10), %s292_s19, 3  ;;  %s1026_s27 = sshll.u32 (!%p257_p10), %s1256_s24, 7 }
  0x13   : > { %s294_s28 = scalar_lea.vmem (!%p257_p10), [#allocation2], %s1010_s20 }
  0x14   : > { %v316_v0 = vld [vmem:[%s1512_s2 + $0x28] sm:$0xff]  ;;  %v1266_v1 = vmov 0.0   ;;  %v315_v2 = vld [vmem:[%s1512_s2 + $0x20] sm:$0xff]  ;;  %vm1267_vm0 = vmmov 0   ;;  %s1380_s15 = scalar_select %p295_p11, %s1256_s24, 1  ;;  %v314_v3 = vld [vmem:[%s1512_s2 + $0x18] sm:$0xff]  ;;  %v482_v21 = vlaneseq }
  0x15   : > { %1055 = vmatprep.subr.mxu1 %v1266_v1  ;;  %1067 = vmatprep.mubr.msk.f32.mxu1 %vm1267_vm0, %v1266_v1  ;;  %v313_v4 = vld [vmem:[%s1512_s2 + $0x10] sm:$0xff]  ;;  %v312_v5 = vld [vmem:[%s1512_s2 + $0x8] sm:$0xff]  ;;  %v311_v6 = vld [vmem:[%s1512_s2] sm:$0xff]  ;;  %vm317_vm1 = vcmask 392192   ;;  %v1268_v19 = vmov 1966171168  }
  0x16   : > { %1056 = vmatpush3.msra.mxu1 %v316_v0  ;;  %s1011_s18 = sshll.u32 %s1380_s15, 3  ;;  %v396_v8 = vld [vmem:[%s1513_s3 + $0x28] sm:$0xff]  ;;  %v395_v9 = vld [vmem:[%s1513_s3 + $0x20] sm:$0xff]  ;;  %v394_v10 = vld [vmem:[%s1513_s3 + $0x18] sm:$0xff]  ;;  %v480_v20 = vunpack.c.l.s4 %v1268_v19  ;;  %v1446_v23 = vshrl.u32 %v482_v21, 7  ;;  %vm587_vm2 = vcmask 261120  }
  0x17   : > { %1057 = vmatprep.subr.mxu1 %v1266_v1  ;;  %s301_s11 = scalar_lea.vmem %s1510_s0, %s1011_s18  ;;  %v393_v11 = vld [vmem:[%s1513_s3 + $0x10] sm:$0xff]  ;;  %v392_v12 = vld [vmem:[%s1513_s3 + $0x8] sm:$0xff]  ;;  %v391_v13 = vld [vmem:[%s1513_s3] sm:$0xff]  ;;  %s1274_s15 = smov 8   ;;  %vm881_vm3 = vcmask 31744   ;;  %vm883_vm4 = vcmask 64512  }
  0x18   : > { %1058 = vmatpush3.msra.mxu1 %v315_v2  ;;  %v309_v7 = vld [vmem:[%s301_s11] sm:$0xff]  ;;  %s308_s11 = scalar_lea.vmem %s1511_s1, %s1011_s18  ;;  %v586_v15 = vld [vmem:[%s1515_s5 + $0x18] sm:$0xff]  ;;  %v585_v16 = vld [vmem:[%s1515_s5 + $0x10] sm:$0xff]  ;;  %v481_v22 = vunpack.c.0.s8 %v480_v20  ;;  %v529_v35 = vsub.s32 0, %v1446_v23  ;;  %s1275_s18 = smov 24   ;;  %vm885_vm5 = vcmask 97280  }
  0x19   : > { %1059 = vmatprep.subr.mxu1 %v1266_v1  ;;  %v310_v14 = vld [vmem:[%s308_s11] sm:$0xff]  ;;  %1085 = vmatprep.subr.mxu0 %v586_v15  ;;  %v584_v17 = vld [vmem:[%s1515_s5 + $0x8] sm:$0xff]  ;;  %vm887_vm6 = vcmask 130048   ;;  %vm889_vm7 = vcmask 162816   ;;  %vm891_vm8 = vcmask 195584   ;;  %vm893_vm9 = vcmask 228352  }
  0x1a   : > { %1060 = vmatpush3.msra.mxu1 %v314_v3  ;;  %1086 = vmatpush3.msra.mxu0 %v586_v15  ;;  %v583_v18 = vld [vmem:[%s1515_s5] sm:$0xff]  ;;  %v484_v25 = vsub.s32 %v481_v22, %v1446_v23  ;;  %v1270_v15 = vmov 1934713408   ;;  %s915_s30 = sshll.u32 %s294_s28, 4  ;;  %s1278_s24 = smov [#allocation2]   ;;  %s916_s30 = int_to_ptr.vmem [resolvable:$true] %s915_s30 }
  0x1b   : > { %1061 = vmatprep.subr.mxu1 %v1266_v1  ;;  %1087 = vmatprep.subr.mxu0 %v585_v16  ;;  %v1014_v31 = vld [vmem:[%s1514_s4] ss:$0 sm:$0xff] }
  0x1c   : > { %1062 = vmatpush3.msra.mxu1 %v313_v4  ;;  %1088 = vmatpush3.msra.mxu0 %v585_v16  ;;  %v784_v16 = vunpack.c.l.s4 %v1270_v15 }
  0x1d   : > { %1063 = vmatprep.subr.mxu1 %v1266_v1  ;;  %1089 = vmatprep.subr.mxu0 %v584_v17 }
  0x1e   : > { %1064 = vmatpush3.msra.mxu1 %v312_v5  ;;  %1090 = vmatpush3.msra.mxu0 %v584_v17 }
  0x1f   : > { %1065 = vmatprep.subr.mxu1 %v1266_v1  ;;  %1091 = vmatprep.subr.mxu0 %v583_v18 }
  0x20   : > { %1066 = vmatpush3.msra.mxu1 %v311_v6  ;;  %1092 = vmatpush3.msra.mxu0 %v583_v18 }
  0x21   : > { %1068 = vmatmul.mubr.msk.f32.vlgmr.msra.gmra.mxu1 %vm317_vm1, %v309_v7  ;;  %1070 = vmatprep.subr.mxu1 %v1266_v1 }
  0x22   : > { %1071 = vmatpush3.msra.mxu1 %v396_v8  ;;  %1082 = vmatprep.mubr.msk.f32.mxu1 %vm1267_vm0, %v1266_v1  ;;  %v1269_v8 = vmov 1983009808  }
  0x23   : > { %1072 = vmatprep.subr.mxu1 %v1266_v1 }
  0x24   : > { %1073 = vmatpush3.msra.mxu1 %v395_v9  ;;  %v720_v9 = vunpack.c.l.s4 %v1269_v8 }
  0x25   : > { %1074 = vmatprep.subr.mxu1 %v1266_v1 }
  0x26   : > { %1075 = vmatpush3.msra.mxu1 %v394_v10 }
  0x27   : > { %1076 = vmatprep.subr.mxu1 %v1266_v1 }
  0x28   : > { %1077 = vmatpush3.msra.mxu1 %v393_v11  ;;  %v721_v11 = vunpack.c.0.s8 %v720_v9 }
  0x29   : > { %1078 = vmatprep.subr.mxu1 %v1266_v1 }
  0x2a   : > { %1079 = vmatpush3.msra.mxu1 %v392_v12  ;;  %v724_v17 = vsub.s32 %v721_v11, %v1446_v23 }
  0x2b   : > { %1080 = vmatprep.subr.mxu1 %v1266_v1 }
  0x2c   : > { %1081 = vmatpush3.msra.mxu1 %v391_v13 }
  0x2d   : > { %1083 = vmatmul.mubr.msk.f32.vlgmr.msra.gmra.mxu1 %vm317_vm1, %v310_v14 }
  0xe1   : > { %v387_v24 = vpop.f32.mrf.mxu1 }
  0xe2   : > { %v485_v27 = vrot.slane %v387_v24, %v484_v25  ;;  %v478_v28 = vcombine.high %v387_v24, %v387_v24  ;;  %v785_v24 = vunpack.c.0.s8 %v784_v16 }
  0xe3   : > { %v1069_v26 = vpop.f32.mrf.mxu1 }
  0xe4   : > { %v493_v29 = vcombine.high %v485_v27, %v485_v27  ;;  %v501_v30 = vrot.slane %v485_v27, %v484_v25  ;;  %v492_v33 = vrot.slane %v478_v28, %v484_v25 }
  0xe6   : > { %v515_v34 = vrot.slane %v493_v29, %v484_v25  ;;  %v523_v38 = vcombine.high %v501_v30, %v501_v30  ;;  %v494_v39 = vcombine.high %v492_v33, %v492_v33  ;;  %v530_v41 = vrot.slane %v501_v30, %v529_v35 }
  0xe7   : > { %v508_v44 = vrot.slane %v492_v33, %v484_v25 }
  0xe8   : > { %v534_v40 = vrot.slane %v515_v34, %v529_v35  ;;  %v525_v42 = vcombine.high %v515_v34, %v515_v34  ;;  %v538_v45 = vrot.slane %v523_v38, %v529_v35  ;;  %v522_v47 = vrot.slane %v494_v39, %v484_v25 }
  0xe9   : > { %v524_v50 = vcombine.high %v508_v44, %v508_v44  ;;  %v546_v51 = vrot.slane %v508_v44, %v529_v35  ;;  %v788_v34 = vsub.s32 %v785_v24, %v1446_v23 }
  0xea   : > { %v542_v49 = vrot.slane %v525_v42, %v529_v35  ;;  %v526_v52 = vcombine.high %v522_v47, %v522_v47  ;;  %v550_v55 = vrot.slane %v522_v47, %v529_v35 }
  0xeb   : > { %v554_v56 = vrot.slane %v524_v50, %v529_v35 }
  0xec   : > { %v558_v57 = vrot.slane %v526_v52, %v529_v35 }
  0xed   : > { %v473_v32 = vpop.f32.mrf.mxu1 }
  0xee   : > { %v474_v37 = vadd.f32 %v1014_v31, %v473_v32 }
  0xef   : > { %v1084_v36 = vpop.f32.mrf.mxu1 }
  0xf0   : > { %v568_v43 = vadd.f32 %v534_v40, %v474_v37  ;;  %v567_v46 = vadd.f32 %v530_v41, %v474_v37  ;;  %v569_v48 = vadd.f32 %v538_v45, %v474_v37  ;;  %v570_v53 = vadd.f32 %v542_v49, %v474_v37 }
  0xf1   : > { %v571_v54 = vadd.f32 %v546_v51, %v474_v37  ;;  %v572_v58 = vadd.f32 %v550_v55, %v474_v37  ;;  %v573_v59 = vadd.f32 %v554_v56, %v474_v37  ;;  %v574_v60 = vadd.f32 %v558_v57, %v474_v37 }
  0xf2   : > { %1172 = vtanh.f32 %v568_v43 }
  0xf3   : > { %1174 = vtanh.f32 %v567_v46 }
  0xf4   : > { %1176 = vtanh.f32 %v569_v48 }
  0xf5   : > { %1178 = vtanh.f32 %v570_v53 }
  0xf6   : > { %1180 = vtanh.f32 %v571_v54 }
  0xf7   : > { %1182 = vtanh.f32 %v572_v58 }
  0xf8   : > { %1184 = vtanh.f32 %v573_v59 }
  0xf9   : > { %1186 = vtanh.f32 %v574_v60 }
  0xff   : > { %v1173_v61 = vpop.eup %1172 }
 0x100   : > { %v1175_v62 = vpop.eup %1174 }
 0x101   : > { %1093 = vmatprep.mubr.msk.f32.mxu0 %vm587_vm2, %v1175_v62  ;;  %v1177_v63 = vpop.eup %1176 }
 0x102   : > { %1094 = vmatmul.mubr.msk.f32.vlgmr.msra.gmra.mxu0 %vm587_vm2, %v1173_v61  ;;  %v1179_v0 = vpop.eup %1178 }
 0x103   : > { %1096 = vmatprep.mubr.msk.f32.mxu0 %vm587_vm2, %v1177_v63  ;;  %v1181_v2 = vpop.eup %1180 }
 0x104   : > { %v1183_v3 = vpop.eup %1182 }
 0x105   : > { %v1185_v4 = vpop.eup %1184 }
 0x106   : > { %1097 = vmatmul.mubr.msk.f32.gmra.mxu0 %vm587_vm2, %v1179_v0  ;;  %v1187_v5 = vpop.eup %1186 }
 0x107   : > { %1099 = vmatprep.mubr.msk.f32.mxu0 %vm587_vm2, %v1181_v2 }
 0x10a   : > { %1100 = vmatmul.mubr.msk.f32.gmra.mxu0 %vm587_vm2, %v1183_v3 }
 0x10b   : > { %1102 = vmatprep.mubr.msk.f32.mxu0 %vm587_vm2, %v1185_v4 }
 0x10e   : > { %1103 = vmatmul.mubr.msk.f32.gmra.mxu0 %vm587_vm2, %v1187_v5 }
 0x1c2   : > { %v1095_v6 = vpop.f32.mrf.mxu0 }
 0x1c4   : > { %v678_v7 = vpop.f32.mrf.mxu0 }
 0x1c6   : > { %v1098_v10 = vpop.f32.mrf.mxu0 }
 0x1c7   : > { %v733_v18 = vcombine.low %v1095_v6, %v1098_v10  ;;  %v734_v27 = vcombine.high %v1095_v6, %v1098_v10 }
 0x1c8   : > { %v688_v12 = vpop.f32.mrf.mxu0 }
 0x1c9   : > { %v717_v13 = vcombine.low %v678_v7, %v688_v12  ;;  %v718_v20 = vcombine.high %v678_v7, %v688_v12  ;;  %v741_v28 = vrot.slane %v733_v18, %v724_v17  ;;  %v748_v40 = vrot.slane %v734_v27, %v724_v17 }
 0x1ca   : > { %v1101_v14 = vpop.f32.mrf.mxu0 }
 0x1cb   : > { %v725_v21 = vrot.slane %v717_v13, %v724_v17  ;;  %v732_v32 = vrot.slane %v718_v20, %v724_v17 }
 0x1cc   : > { %v698_v19 = vpop.f32.mrf.mxu0 }
 0x1cd   : > { %v782_v33 = vcombine.high %v725_v21, %v741_v28  ;;  %v781_v35 = vcombine.low %v725_v21, %v741_v28  ;;  %v797_v44 = vcombine.low %v732_v32, %v748_v40  ;;  %v798_v23 = vcombine.high %v732_v32, %v748_v40 }
 0x1ce   : > { %v1104_v22 = vpop.f32.mrf.mxu0 }
 0x1cf   : > { %v765_v25 = vcombine.low %v1101_v14, %v1104_v22  ;;  %v766_v26 = vcombine.high %v1101_v14, %v1104_v22  ;;  %v796_v45 = vrot.slane %v782_v33, %v788_v34  ;;  %v789_v47 = vrot.slane %v781_v35, %v788_v34 }
 0x1d0   : > { %v708_v29 = vpop.f32.mrf.mxu0  ;;  %v805_v54 = vrot.slane %v797_v44, %v788_v34  ;;  %v812_v58 = vrot.slane %v798_v23, %v788_v34 }
 0x1d1   : > { %v749_v30 = vcombine.low %v698_v19, %v708_v29  ;;  %v750_v31 = vcombine.high %v698_v19, %v708_v29  ;;  %v773_v36 = vrot.slane %v765_v25, %v724_v17  ;;  %v780_v37 = vrot.slane %v766_v26, %v724_v17 }
 0x1d3   : > { %v757_v38 = vrot.slane %v749_v30, %v724_v17  ;;  %v764_v39 = vrot.slane %v750_v31, %v724_v17 }
 0x1d5   : > { %v813_v41 = vcombine.low %v757_v38, %v773_v36  ;;  %v814_v42 = vcombine.high %v757_v38, %v773_v36  ;;  %v829_v43 = vcombine.low %v764_v39, %v780_v37  ;;  %v830_v49 = vcombine.high %v764_v39, %v780_v37 }
 0x1d7   : > { %v828_v46 = vrot.slane %v814_v42, %v788_v34  ;;  %v821_v48 = vrot.slane %v813_v41, %v788_v34  ;;  %v837_v53 = vrot.slane %v829_v43, %v788_v34  ;;  %v844_v57 = vrot.slane %v830_v49, %v788_v34 }
 0x1d9   : > { %v848_v50 = vcombine.high %v796_v45, %v828_v46  ;;  %v846_v51 = vcombine.high %v789_v47, %v821_v48  ;;  %v845_v52 = vcombine.low %v789_v47, %v821_v48  ;;  %v849_v55 = vcombine.low %v805_v54, %v837_v53 }
 0x1da   : > { %v847_v56 = vcombine.low %v796_v45, %v828_v46  ;;  %v851_v59 = vcombine.low %v812_v58, %v844_v57  ;;  %v850_v60 = vcombine.high %v805_v54, %v837_v53  ;;  %v852_v61 = vcombine.high %v812_v58, %v844_v57 }
 0x1db   : > { %862 = vrot.lane.b32.xlu1 %v848_v50, %s1271_s12  ;;  %854 = vrot.lane.b32.xlu0 %v846_v51, %s1272_s13  ;;  %s1468_s12 = scalar_lea.hbm %s1516_s6, %s1026_s27  ;;  %s900_s13 = scalar_lea.sflag [#allocation3], %s292_s19 }
 0x1df   : > { %866 = vrot.lane.b32.xlu1 %v849_v55, %s1273_s14  ;;  %858 = vrot.lane.b32.xlu0 %v847_v56, %s1274_s15  ;;  %s1188_s14 = scalar_lea.vmem %s916_s30, 128  ;;  %s1192_s15 = sshll.u32 %s1278_s24, 4  ;;  %s1193_s15 = int_to_ptr.vmem [resolvable:$false] %s1192_s15 }
 0x1e0   : > { %p1189_p12 = scmp.ne.s32.totalorder %s916_s30, %s1188_s14  ;;  %p1195_p1 = scmp.lt.s32.totalorder %s916_s30, %s1193_s15 }
 0x1e2   : > { %p1190_p13 = pnand %p1189_p12, %p1354_p4 }
 0x1e3   : > { %874 = vrot.lane.b32.xlu1 %v851_v59, %s1275_s18  ;;  %870 = vrot.lane.b32.xlu0 %v850_v60, %s1276_s16  ;;  %s1194_s18 = scalar_lea.vmem %s1193_s15, 256 }
 0x1e4   : > { %p1191_p0 = pneg %p1190_p13  ;;  %p1196_p2 = scmp.lt.s32.totalorder %s1194_s18, %s1188_s14 }
 0x1e6   : > { %p1197_p3 = por %p1196_p2, %p1195_p1 }
 0x1e7   : > { %878 = vrot.lane.b32.xlu0 %v852_v61, %s1277_s17 }
 0x1e8   : > { %p1198_p5 = pnand %p1197_p3, %p1191_p0 }
 0x24d   : > { %v863_v62 = vpop.permute.xlu1 %862  ;;  %v855_v63 = vpop.permute.xlu0 %854 }
 0x24e   : > { %v882_v0 = vsel %vm881_vm3, %v845_v52, %v855_v63 }
 0x251   : > { %v867_v2 = vpop.permute.xlu1 %866  ;;  %v859_v3 = vpop.permute.xlu0 %858 }
 0x252   : > { %v884_v4 = vsel %vm883_vm4, %v882_v0, %v859_v3 }
 0x253   : > { %v886_v5 = vsel %vm885_vm5, %v884_v4, %v863_v62 }
 0x254   : > { %v888_v6 = vsel %vm887_vm6, %v886_v5, %v867_v2 }
 0x255   : > { %v871_v7 = vpop.permute.xlu0 %870  ;;  %v875_v8 = vpop.permute.xlu1 %874 }
 0x256   : > { %v890_v9 = vsel %vm889_vm7, %v888_v6, %v871_v7 }
 0x257   : > { %v892_v11 = vsel %vm891_vm8, %v890_v9, %v875_v8 }
 0x259   : > { %v879_v10 = vpop.permute.xlu0 %878 }
 0x25a   : > { %v894_v12 = vsel %vm893_vm9, %v892_v11, %v879_v10 }
 0x25b   : > { %vm895_vm10 = vcmp.gt.f32.partialorder %v894_v12, 0.0 }
 0x25c   : > { %v1024_v13 = vsel %vm895_vm10, 1.0, %v1266_v1 }
 0x25d   : > { %898 = vst.msk [vmem:[%s294_s28] sm:$0xff] %vm587_vm2, %v1024_v13 }
 0x25e   : > { %1201 = shalt.err (!%p1198_p5)
}
 0x25f   : > { %s1202_s16 = scalar_lea.hbm %s1468_s12, 128  ;;  %s1206_s20 = scalar_lea.hbm %s1516_s6, 256 }
 0x260   : > { %p1203_p6 = scmp.ne.s32.totalorder %s1468_s12, %s1202_s16  ;;  %p1207_p10 = scmp.lt.s32.totalorder %s1468_s12, %s1516_s6 }
 0x261   : > { %p1208_p11 = scmp.lt.s32.totalorder %s1206_s20, %s1202_s16 }
 0x262   : > { %p1204_p7 = pnand %p1203_p6, %p1354_p4 }
 0x263   : > { %p1209_p12 = por %p1208_p11, %p1207_p10 }
 0x264   : > { %p1205_p9 = pneg %p1204_p7 }
 0x266   : > { %p1210_p13 = pnand %p1209_p12, %p1205_p9 }
 0x268   : > { %1213 = shalt.err (!%p1210_p13)
}
 0x269   : > { %1105 = dma.vmem_to_hbm [thread:$0]  (%p1354_p4), %s916_s30, 128, %s1468_s12, %s900_s13  }
 0x26a PF: > { %p1111_p0 = scmp.ge.s32.totalorder %s1264_s26, 2  ;;  %s927_s8 = sand.u32 1, %s1244_s21  }
 0x26b   : > { %s928_s11 = scalar_lea.sflag [#allocation3], %s927_s8 }
 0x26c   : > { %p1108_p1 = pnand %p1111_p0, %p1361_p8 }
 0x26e   : > { %p1109_p2 = pneg %p1108_p1 }
 0x270   : > { %1239 = dma.done.wait (%p1109_p2), %s928_s11, 128  }
 0x271   : > { %1241 = vsyncadd (%p1109_p2), %s928_s11, 4294967168  ;;  %s19_s26 = sadd.s32 1, %s1264_s26   ;;  %s1519_s21 = smov %s1248_s22 }
 0x272   : > { %p16_p3 = scmp.ge.s32.totalorder %s19_s26, 4   ;;  %s1520_s22 = smov %s1252_s23 }
 0x273   : > { %s1521_s23 = smov %s1367_s10  ;;  %s1522_s24 = smov %s1260_s25 }
 0x274   : > { %s1523_s25 = smov %s1525_s29  ;;  %18 = sbr.rel (!%p16_p3) target bundleno = 4 (0x4), region = 82 }
 0x279   :  { %933 = vsyncpa [#allocation3], 1 }
 0x27a   :  { %935 = vsyncpa [#allocation3 + $0x1], 1 }

</bundles_post_ra>
